<compile_context>
chip_gen: v7x
topology: tpu7x:2x2x1
jax: 0.10.0
libtpu: 0.0.40
codegen_flags: <defaults>
</compile_context>

<pallas_src>
import functools

import jax
import jax.numpy as jnp
from jax import lax
from jax.experimental import pallas as pl
from jax.experimental.pallas import tpu as pltpu

LANE = 128


def _gauss_dist_kernel(mu_a_ref, va_ref, mu_b_ref, vb_ref, out_ref, *scratch,
                       d, var_is_log, needs_mask):
    """One feature tile: lane-dense partial of 0.5*(vaa + vbb - 2*vab)."""
    n, sblk, lane = mu_a_ref.shape

    if var_is_log:
        # kern==1 path: convert logvar -> var once per tile into VMEM scratch
        # (minimal EUP work), then slice per-sample from the scratch refs.
        ea_ref, eb_ref = scratch
        ea_ref[...] = jnp.exp(va_ref[...])
        eb_ref[...] = jnp.exp(vb_ref[...])
        va_src, vb_src = ea_ref, eb_ref
    else:
        va_src, vb_src = va_ref, vb_ref

    def cross(mu1_ref, v1_ref, i1, mu2_ref, v2_ref, i2):
        # exp(-0.5*diff^2/vsum)/sqrt(vsum) with 1 rsqrt + 1 exp; the -0.5 is
        # folded into r*(-0.5*r) to shave a VALU mul.  Operands are sliced
        # from the refs per pair (keeps vreg pressure bounded at large tiles).
        diff = mu1_ref[i1] - mu2_ref[i2]
        r = lax.rsqrt(v1_ref[i1] + v2_ref[i2])
        return jnp.exp((diff * diff) * (r * (-0.5 * r))) * r

    acc = jnp.zeros((sblk, lane), jnp.float32)
    for i in range(n):
        # diagonal of vaa / vbb: diff == 0 -> rsqrt(2*var), no exp; the global
        # weight 0.5 (since the wrapper multiplies by 2) folds into rsqrt(8v).
        acc = acc + lax.rsqrt(8.0 * va_src[i]) + lax.rsqrt(8.0 * vb_src[i])
        # strict upper triangle of vaa / vbb (symmetry; weight 2 applied last).
        for j in range(i + 1, n):
            acc = acc + cross(mu_a_ref, va_src, i, mu_a_ref, va_src, j)
            acc = acc + cross(mu_b_ref, vb_src, i, mu_b_ref, vb_src, j)
        # full cross term vab (weight -2 applied last).
        for j in range(n):
            acc = acc - cross(mu_a_ref, va_src, i, mu_b_ref, vb_src, j)

    if needs_mask:
        # In-kernel ragged-tail mask (no mask DMA stream): global flat feature
        # index of (row, lane) in this tile compared against the static d.
        base = pl.program_id(0) * (sblk * lane)
        row = lax.broadcasted_iota(jnp.int32, (sblk, lane), 0)
        col = lax.broadcasted_iota(jnp.int32, (sblk, lane), 1)
        acc = jnp.where(base + row * lane + col < d, acc, 0.0)

    # Lane-dense partial: reduce sublanes once per tile (XLU); the final *2
    # and the lane/grid sums happen in the wrapper.
    out_ref[...] = jnp.sum(acc, axis=0, keepdims=True)[None]


def _avgpool_nchw(x, kern):
    # nn.AvgPool2d(kernel_size=kern, stride=kern) with H, W divisible by kern.
    if kern == 1:
        return x
    n, c, h, w = x.shape
    return x.reshape(n, c, h // kern, kern, w // kern, kern).mean(axis=(3, 5))


@functools.partial(jax.jit, static_argnames=("kern",))
def gaussian_distance(mu_a, logvar_a, mu_b, logvar_b, kern=1):
    n = mu_a.shape[0]

    mu_a_p = _avgpool_nchw(mu_a, kern)
    mu_b_p = _avgpool_nchw(mu_b, kern)
    if kern == 1:
        # avgpool is identity -> feed logvar directly, exp happens in-kernel
        # (saves a full HBM read+write pass of each variance tensor).
        raw_a, raw_b = logvar_a, logvar_b
        var_is_log = True
    else:
        raw_a = _avgpool_nchw(jnp.exp(logvar_a), kern) / float(kern * kern)
        raw_b = _avgpool_nchw(jnp.exp(logvar_b), kern) / float(kern * kern)
        var_is_log = False

    d = mu_a_p.size // n

    # ---- feature tiling --------------------------------------------------
    s_raw = -(-d // LANE)                       # 128-lane slabs per sample
    # ~2 MiB per input block: safe on v7x (64 MiB VMEM) with 4 double-buffered
    # streams + scratch, and big enough that the 0.35us grid-step overhead and
    # DMA are fully hidden on all generations.
    cap = min(2048, max(8, ((2 << 20) // (n * LANE * 4)) // 8 * 8))
    if s_raw <= 8:
        sblk = s_raw                            # single full-extent tile
    else:
        # aim for >= 2 tiles so the "parallel" feature axis feeds both v7x TCs
        half = ((-(-s_raw // 2)) + 7) // 8 * 8
        sblk = min(cap, half)
    s_tot = -(-s_raw // sblk) * sblk
    d_pad = s_tot * LANE
    grid = (s_tot // sblk,)
    needs_mask = d_pad != d                     # static

    vpad = 0.0 if var_is_log else 1.0           # exp(0)=1 / rsqrt(1) finite

    def prep(t, pad_val):
        t = t.reshape(n, d).astype(jnp.float32)
        if d_pad != d:                          # pad only when D doesn't tile
            t = jnp.pad(t, ((0, 0), (0, d_pad - d)), constant_values=pad_val)
        return t.reshape(n, s_tot, LANE)

    mu_a_f = prep(mu_a_p, 0.0)
    mu_b_f = prep(mu_b_p, 0.0)
    var_a_f = prep(raw_a, vpad)
    var_b_f = prep(raw_b, vpad)

    feat_spec = pl.BlockSpec((n, sblk, LANE), lambda i: (0, i, 0))
    kernel = functools.partial(_gauss_dist_kernel, d=d,
                               var_is_log=var_is_log, needs_mask=needs_mask)

    scratch_shapes = []
    if var_is_log:
        scratch_shapes = [pltpu.VMEM((n, sblk, LANE), jnp.float32),
                          pltpu.VMEM((n, sblk, LANE), jnp.float32)]

    partials = pl.pallas_call(
        kernel,
        out_shape=jax.ShapeDtypeStruct((grid[0], 1, LANE), jnp.float32),
        grid_spec=pltpu.PrefetchScalarGridSpec(
            num_scalar_prefetch=0,
            grid=grid,
            in_specs=[feat_spec, feat_spec, feat_spec, feat_spec],
            out_specs=pl.BlockSpec((1, 1, LANE), lambda i: (i, 0, 0)),
            scratch_shapes=scratch_shapes,
        ),
        compiler_params=pltpu.CompilerParams(
            dimension_semantics=("parallel",),
            vmem_limit_bytes=48 * 1024 * 1024),
    )(mu_a_f, var_a_f, mu_b_f, var_b_f)

    # factor 2 (symmetry / -2*vab weight) applied once here, outside the kernel
    return 2.0 * jnp.sum(partials)


def _reference(mu_a, logvar_a, mu_b, logvar_b, kern=1):
    # pure-JAX reference mirroring the PyTorch module exactly
    mu_a = _avgpool_nchw(mu_a, kern)
    mu_b = _avgpool_nchw(mu_b, kern)
    var_a = _avgpool_nchw(jnp.exp(logvar_a), kern) / (kern * kern)
    var_b = _avgpool_nchw(jnp.exp(logvar_b), kern) / (kern * kern)
    n = mu_a.shape[0]
    f = lambda t: t.reshape(n, -1)
    mu_a, var_a, mu_b, var_b = f(mu_a), f(var_a), f(mu_b), f(var_b)

    def pair(mu1, var1, mu2, var2):
        d2 = (mu1[:, None, :] - mu2[None, :, :]) ** 2
        vs = var1[:, None, :] + var2[None, :, :]
        return jnp.sum(jnp.exp(-0.5 * d2 / vs) / jnp.sqrt(vs))

    vaa = pair(mu_a, var_a, mu_a, var_a)
    vab = pair(mu_a, var_a, mu_b, var_b)
    vbb = pair(mu_b, var_b, mu_b, var_b)
    return vaa + vbb - 2.0 * vab


if __name__ == "__main__":
    key = jax.random.PRNGKey(0)

    def make(shape, key):
        k1, k2, k3, k4 = jax.random.split(key, 4)
        return (jax.random.normal(k1, shape, dtype=jnp.float32),
                0.1 * jax.random.normal(k2, shape, dtype=jnp.float32),
                jax.random.normal(k3, shape, dtype=jnp.float32),
                0.1 * jax.random.normal(k4, shape, dtype=jnp.float32))

    # Case 1: module default (kern=1), N=2, C=4, H=W=16 (d=1024, no padding).
    a = make((2, 4, 16, 16), key)
    loss = gaussian_distance(*a, kern=1)
    jax.block_until_ready(loss)
    ref = _reference(*a, kern=1)
    assert jnp.allclose(loss, ref, rtol=1e-4, atol=1e-3), (loss, ref)

    # Case 2: kern=2 (avgpool + explicit-variance path, full-extent tile).
    loss2 = gaussian_distance(*a, kern=2)
    jax.block_until_ready(loss2)
    ref2 = _reference(*a, kern=2)
    assert jnp.allclose(loss2, ref2, rtol=1e-4, atol=1e-3), (loss2, ref2)

    # Case 3: ragged feature dim (d=300) -> exercises in-kernel iota mask.
    b = make((2, 3, 10, 10), jax.random.PRNGKey(1))
    loss3 = gaussian_distance(*b, kern=1)
    jax.block_until_ready(loss3)
    ref3 = _reference(*b, kern=1)
    assert jnp.allclose(loss3, ref3, rtol=1e-4, atol=1e-3), (loss3, ref3)

    print("KERNEL_OK")
</pallas_src>

<mosaic_0001>
module attributes {stable_mosaic.version = 11 : i64} {
  func.func @_gauss_dist_kernel(%arg0: i32, %arg1: memref<2x8x128xf32, #tpu.memory_space<vmem>>, %arg2: memref<2x8x128xf32, #tpu.memory_space<vmem>>, %arg3: memref<2x8x128xf32, #tpu.memory_space<vmem>>, %arg4: memref<2x8x128xf32, #tpu.memory_space<vmem>>, %arg5: memref<1x1x128xf32, #tpu.memory_space<vmem>>, %arg6: memref<2x8x128xf32, #tpu.memory_space<vmem>>, %arg7: memref<2x8x128xf32, #tpu.memory_space<vmem>>) attributes {dimension_semantics = [#tpu.dimension_semantics<parallel>], iteration_bounds = array<i64: 1>, scalar_prefetch = 0 : i64, scratch_operands = 2 : i64, tpu.core_type = #tpu.core_type<tc>, window_params = [{transform_indices = @transform_0, window_bounds = array<i64: 2, 8, 128>}, {transform_indices = @transform_1, window_bounds = array<i64: 2, 8, 128>}, {transform_indices = @transform_2, window_bounds = array<i64: 2, 8, 128>}, {transform_indices = @transform_3, window_bounds = array<i64: 2, 8, 128>}, {transform_indices = @transform_4, window_bounds = array<i64: 1, 1, 128>}]} {
    %c0 = arith.constant 0 : index
    %c0_0 = arith.constant 0 : index
    %c0_1 = arith.constant 0 : index
    %0 = vector.load %arg2[%c0, %c0_0, %c0_1] : memref<2x8x128xf32, #tpu.memory_space<vmem>>, vector<2x8x128xf32>
    %1 = math.exp %0 : vector<2x8x128xf32>
    %c0_2 = arith.constant 0 : index
    %c0_3 = arith.constant 0 : index
    %c0_4 = arith.constant 0 : index
    %2 = vector.load %arg6[%c0_2, %c0_3, %c0_4] : memref<2x8x128xf32, #tpu.memory_space<vmem>>, vector<2x8x128xf32>
    tpu.vector_store %arg6[%c0_2, %c0_3, %c0_4], %1 {strides = array<i32>} : memref<2x8x128xf32, #tpu.memory_space<vmem>>, vector<2x8x128xf32>,
    %c0_5 = arith.constant 0 : index
    %c0_6 = arith.constant 0 : index
    %c0_7 = arith.constant 0 : index
    %3 = vector.load %arg4[%c0_5, %c0_6, %c0_7] : memref<2x8x128xf32, #tpu.memory_space<vmem>>, vector<2x8x128xf32>
    %4 = math.exp %3 : vector<2x8x128xf32>
    %c0_8 = arith.constant 0 : index
    %c0_9 = arith.constant 0 : index
    %c0_10 = arith.constant 0 : index
    %5 = vector.load %arg7[%c0_8, %c0_9, %c0_10] : memref<2x8x128xf32, #tpu.memory_space<vmem>>, vector<2x8x128xf32>
    tpu.vector_store %arg7[%c0_8, %c0_9, %c0_10], %4 {strides = array<i32>} : memref<2x8x128xf32, #tpu.memory_space<vmem>>, vector<2x8x128xf32>,
    %cst = arith.constant 0.000000e+00 : f32
    %6 = vector.broadcast %cst : f32 to vector<8x128xf32>
    %c0_11 = arith.constant 0 : index
    %c0_12 = arith.constant 0 : index
    %c0_13 = arith.constant 0 : index
    %7 = vector.load %arg6[%c0_11, %c0_12, %c0_13] : memref<2x8x128xf32, #tpu.memory_space<vmem>>, vector<1x8x128xf32>
    %8 = vector.shape_cast %7 : vector<1x8x128xf32> to vector<8x128xf32>
    %cst_14 = arith.constant 8.000000e+00 : f32
    %9 = vector.broadcast %cst_14 : f32 to vector<8x128xf32>
    %10 = arith.mulf %9, %8 : vector<8x128xf32>
    %11 = math.rsqrt %10 : vector<8x128xf32>
    %12 = arith.addf %6, %11 : vector<8x128xf32>
    %c0_15 = arith.constant 0 : index
    %c0_16 = arith.constant 0 : index
    %c0_17 = arith.constant 0 : index
    %13 = vector.load %arg7[%c0_15, %c0_16, %c0_17] : memref<2x8x128xf32, #tpu.memory_space<vmem>>, vector<1x8x128xf32>
    %14 = vector.shape_cast %13 : vector<1x8x128xf32> to vector<8x128xf32>
    %cst_18 = arith.constant 8.000000e+00 : f32
    %15 = vector.broadcast %cst_18 : f32 to vector<8x128xf32>
    %16 = arith.mulf %15, %14 : vector<8x128xf32>
    %17 = math.rsqrt %16 : vector<8x128xf32>
    %18 = arith.addf %12, %17 : vector<8x128xf32>
    %c0_19 = arith.constant 0 : index
    %c0_20 = arith.constant 0 : index
    %c0_21 = arith.constant 0 : index
    %19 = vector.load %arg1[%c0_19, %c0_20, %c0_21] : memref<2x8x128xf32, #tpu.memory_space<vmem>>, vector<1x8x128xf32>
    %20 = vector.shape_cast %19 : vector<1x8x128xf32> to vector<8x128xf32>
    %c1 = arith.constant 1 : index
    %c0_22 = arith.constant 0 : index
    %c0_23 = arith.constant 0 : index
    %21 = vector.load %arg1[%c1, %c0_22, %c0_23] : memref<2x8x128xf32, #tpu.memory_space<vmem>>, vector<1x8x128xf32>
    %22 = vector.shape_cast %21 : vector<1x8x128xf32> to vector<8x128xf32>
    %23 = arith.subf %20, %22 : vector<8x128xf32>
    %c0_24 = arith.constant 0 : index
    %c0_25 = arith.constant 0 : index
    %c0_26 = arith.constant 0 : index
    %24 = vector.load %arg6[%c0_24, %c0_25, %c0_26] : memref<2x8x128xf32, #tpu.memory_space<vmem>>, vector<1x8x128xf32>
    %25 = vector.shape_cast %24 : vector<1x8x128xf32> to vector<8x128xf32>
    %c1_27 = arith.constant 1 : index
    %c0_28 = arith.constant 0 : index
    %c0_29 = arith.constant 0 : index
    %26 = vector.load %arg6[%c1_27, %c0_28, %c0_29] : memref<2x8x128xf32, #tpu.memory_space<vmem>>, vector<1x8x128xf32>
    %27 = vector.shape_cast %26 : vector<1x8x128xf32> to vector<8x128xf32>
    %28 = arith.addf %25, %27 : vector<8x128xf32>
    %29 = math.rsqrt %28 : vector<8x128xf32>
    %30 = arith.mulf %23, %23 : vector<8x128xf32>
    %cst_30 = arith.constant -5.000000e-01 : f32
    %31 = vector.broadcast %cst_30 : f32 to vector<8x128xf32>
    %32 = arith.mulf %31, %29 : vector<8x128xf32>
    %33 = arith.mulf %29, %32 : vector<8x128xf32>
    %34 = arith.mulf %30, %33 : vector<8x128xf32>
    %35 = math.exp %34 : vector<8x128xf32>
    %36 = arith.mulf %35, %29 : vector<8x128xf32>
    %37 = arith.addf %18, %36 : vector<8x128xf32>
    %c0_31 = arith.constant 0 : index
    %c0_32 = arith.constant 0 : index
    %c0_33 = arith.constant 0 : index
    %38 = vector.load %arg3[%c0_31, %c0_32, %c0_33] : memref<2x8x128xf32, #tpu.memory_space<vmem>>, vector<1x8x128xf32>
    %39 = vector.shape_cast %38 : vector<1x8x128xf32> to vector<8x128xf32>
    %c1_34 = arith.constant 1 : index
    %c0_35 = arith.constant 0 : index
    %c0_36 = arith.constant 0 : index
    %40 = vector.load %arg3[%c1_34, %c0_35, %c0_36] : memref<2x8x128xf32, #tpu.memory_space<vmem>>, vector<1x8x128xf32>
    %41 = vector.shape_cast %40 : vector<1x8x128xf32> to vector<8x128xf32>
    %42 = arith.subf %39, %41 : vector<8x128xf32>
    %c0_37 = arith.constant 0 : index
    %c0_38 = arith.constant 0 : index
    %c0_39 = arith.constant 0 : index
    %43 = vector.load %arg7[%c0_37, %c0_38, %c0_39] : memref<2x8x128xf32, #tpu.memory_space<vmem>>, vector<1x8x128xf32>
    %44 = vector.shape_cast %43 : vector<1x8x128xf32> to vector<8x128xf32>
    %c1_40 = arith.constant 1 : index
    %c0_41 = arith.constant 0 : index
    %c0_42 = arith.constant 0 : index
    %45 = vector.load %arg7[%c1_40, %c0_41, %c0_42] : memref<2x8x128xf32, #tpu.memory_space<vmem>>, vector<1x8x128xf32>
    %46 = vector.shape_cast %45 : vector<1x8x128xf32> to vector<8x128xf32>
    %47 = arith.addf %44, %46 : vector<8x128xf32>
    %48 = math.rsqrt %47 : vector<8x128xf32>
    %49 = arith.mulf %42, %42 : vector<8x128xf32>
    %cst_43 = arith.constant -5.000000e-01 : f32
    %50 = vector.broadcast %cst_43 : f32 to vector<8x128xf32>
    %51 = arith.mulf %50, %48 : vector<8x128xf32>
    %52 = arith.mulf %48, %51 : vector<8x128xf32>
    %53 = arith.mulf %49, %52 : vector<8x128xf32>
    %54 = math.exp %53 : vector<8x128xf32>
    %55 = arith.mulf %54, %48 : vector<8x128xf32>
    %56 = arith.addf %37, %55 : vector<8x128xf32>
    %c0_44 = arith.constant 0 : index
    %c0_45 = arith.constant 0 : index
    %c0_46 = arith.constant 0 : index
    %57 = vector.load %arg1[%c0_44, %c0_45, %c0_46] : memref<2x8x128xf32, #tpu.memory_space<vmem>>, vector<1x8x128xf32>
    %58 = vector.shape_cast %57 : vector<1x8x128xf32> to vector<8x128xf32>
    %c0_47 = arith.constant 0 : index
    %c0_48 = arith.constant 0 : index
    %c0_49 = arith.constant 0 : index
    %59 = vector.load %arg3[%c0_47, %c0_48, %c0_49] : memref<2x8x128xf32, #tpu.memory_space<vmem>>, vector<1x8x128xf32>
    %60 = vector.shape_cast %59 : vector<1x8x128xf32> to vector<8x128xf32>
    %61 = arith.subf %58, %60 : vector<8x128xf32>
    %c0_50 = arith.constant 0 : index
    %c0_51 = arith.constant 0 : index
    %c0_52 = arith.constant 0 : index
    %62 = vector.load %arg6[%c0_50, %c0_51, %c0_52] : memref<2x8x128xf32, #tpu.memory_space<vmem>>, vector<1x8x128xf32>
    %63 = vector.shape_cast %62 : vector<1x8x128xf32> to vector<8x128xf32>
    %c0_53 = arith.constant 0 : index
    %c0_54 = arith.constant 0 : index
    %c0_55 = arith.constant 0 : index
    %64 = vector.load %arg7[%c0_53, %c0_54, %c0_55] : memref<2x8x128xf32, #tpu.memory_space<vmem>>, vector<1x8x128xf32>
    %65 = vector.shape_cast %64 : vector<1x8x128xf32> to vector<8x128xf32>
    %66 = arith.addf %63, %65 : vector<8x128xf32>
    %67 = math.rsqrt %66 : vector<8x128xf32>
    %68 = arith.mulf %61, %61 : vector<8x128xf32>
    %cst_56 = arith.constant -5.000000e-01 : f32
    %69 = vector.broadcast %cst_56 : f32 to vector<8x128xf32>
    %70 = arith.mulf %69, %67 : vector<8x128xf32>
    %71 = arith.mulf %67, %70 : vector<8x128xf32>
    %72 = arith.mulf %68, %71 : vector<8x128xf32>
    %73 = math.exp %72 : vector<8x128xf32>
    %74 = arith.mulf %73, %67 : vector<8x128xf32>
    %75 = arith.subf %56, %74 : vector<8x128xf32>
    %c0_57 = arith.constant 0 : index
    %c0_58 = arith.constant 0 : index
    %c0_59 = arith.constant 0 : index
    %76 = vector.load %arg1[%c0_57, %c0_58, %c0_59] : memref<2x8x128xf32, #tpu.memory_space<vmem>>, vector<1x8x128xf32>
    %77 = vector.shape_cast %76 : vector<1x8x128xf32> to vector<8x128xf32>
    %c1_60 = arith.constant 1 : index
    %c0_61 = arith.constant 0 : index
    %c0_62 = arith.constant 0 : index
    %78 = vector.load %arg3[%c1_60, %c0_61, %c0_62] : memref<2x8x128xf32, #tpu.memory_space<vmem>>, vector<1x8x128xf32>
    %79 = vector.shape_cast %78 : vector<1x8x128xf32> to vector<8x128xf32>
    %80 = arith.subf %77, %79 : vector<8x128xf32>
    %c0_63 = arith.constant 0 : index
    %c0_64 = arith.constant 0 : index
    %c0_65 = arith.constant 0 : index
    %81 = vector.load %arg6[%c0_63, %c0_64, %c0_65] : memref<2x8x128xf32, #tpu.memory_space<vmem>>, vector<1x8x128xf32>
    %82 = vector.shape_cast %81 : vector<1x8x128xf32> to vector<8x128xf32>
    %c1_66 = arith.constant 1 : index
    %c0_67 = arith.constant 0 : index
    %c0_68 = arith.constant 0 : index
    %83 = vector.load %arg7[%c1_66, %c0_67, %c0_68] : memref<2x8x128xf32, #tpu.memory_space<vmem>>, vector<1x8x128xf32>
    %84 = vector.shape_cast %83 : vector<1x8x128xf32> to vector<8x128xf32>
    %85 = arith.addf %82, %84 : vector<8x128xf32>
    %86 = math.rsqrt %85 : vector<8x128xf32>
    %87 = arith.mulf %80, %80 : vector<8x128xf32>
    %cst_69 = arith.constant -5.000000e-01 : f32
    %88 = vector.broadcast %cst_69 : f32 to vector<8x128xf32>
    %89 = arith.mulf %88, %86 : vector<8x128xf32>
    %90 = arith.mulf %86, %89 : vector<8x128xf32>
    %91 = arith.mulf %87, %90 : vector<8x128xf32>
    %92 = math.exp %91 : vector<8x128xf32>
    %93 = arith.mulf %92, %86 : vector<8x128xf32>
    %94 = arith.subf %75, %93 : vector<8x128xf32>
    %c1_70 = arith.constant 1 : index
    %c0_71 = arith.constant 0 : index
    %c0_72 = arith.constant 0 : index
    %95 = vector.load %arg6[%c1_70, %c0_71, %c0_72] : memref<2x8x128xf32, #tpu.memory_space<vmem>>, vector<1x8x128xf32>
    %96 = vector.shape_cast %95 : vector<1x8x128xf32> to vector<8x128xf32>
    %cst_73 = arith.constant 8.000000e+00 : f32
    %97 = vector.broadcast %cst_73 : f32 to vector<8x128xf32>
    %98 = arith.mulf %97, %96 : vector<8x128xf32>
    %99 = math.rsqrt %98 : vector<8x128xf32>
    %100 = arith.addf %94, %99 : vector<8x128xf32>
    %c1_74 = arith.constant 1 : index
    %c0_75 = arith.constant 0 : index
    %c0_76 = arith.constant 0 : index
    %101 = vector.load %arg7[%c1_74, %c0_75, %c0_76] : memref<2x8x128xf32, #tpu.memory_space<vmem>>, vector<1x8x128xf32>
    %102 = vector.shape_cast %101 : vector<1x8x128xf32> to vector<8x128xf32>
    %cst_77 = arith.constant 8.000000e+00 : f32
    %103 = vector.broadcast %cst_77 : f32 to vector<8x128xf32>
    %104 = arith.mulf %103, %102 : vector<8x128xf32>
    %105 = math.rsqrt %104 : vector<8x128xf32>
    %106 = arith.addf %100, %105 : vector<8x128xf32>
    %c1_78 = arith.constant 1 : index
    %c0_79 = arith.constant 0 : index
    %c0_80 = arith.constant 0 : index
    %107 = vector.load %arg1[%c1_78, %c0_79, %c0_80] : memref<2x8x128xf32, #tpu.memory_space<vmem>>, vector<1x8x128xf32>
    %108 = vector.shape_cast %107 : vector<1x8x128xf32> to vector<8x128xf32>
    %c0_81 = arith.constant 0 : index
    %c0_82 = arith.constant 0 : index
    %c0_83 = arith.constant 0 : index
    %109 = vector.load %arg3[%c0_81, %c0_82, %c0_83] : memref<2x8x128xf32, #tpu.memory_space<vmem>>, vector<1x8x128xf32>
    %110 = vector.shape_cast %109 : vector<1x8x128xf32> to vector<8x128xf32>
    %111 = arith.subf %108, %110 : vector<8x128xf32>
    %c1_84 = arith.constant 1 : index
    %c0_85 = arith.constant 0 : index
    %c0_86 = arith.constant 0 : index
    %112 = vector.load %arg6[%c1_84, %c0_85, %c0_86] : memref<2x8x128xf32, #tpu.memory_space<vmem>>, vector<1x8x128xf32>
    %113 = vector.shape_cast %112 : vector<1x8x128xf32> to vector<8x128xf32>
    %c0_87 = arith.constant 0 : index
    %c0_88 = arith.constant 0 : index
    %c0_89 = arith.constant 0 : index
    %114 = vector.load %arg7[%c0_87, %c0_88, %c0_89] : memref<2x8x128xf32, #tpu.memory_space<vmem>>, vector<1x8x128xf32>
    %115 = vector.shape_cast %114 : vector<1x8x128xf32> to vector<8x128xf32>
    %116 = arith.addf %113, %115 : vector<8x128xf32>
    %117 = math.rsqrt %116 : vector<8x128xf32>
    %118 = arith.mulf %111, %111 : vector<8x128xf32>
    %cst_90 = arith.constant -5.000000e-01 : f32
    %119 = vector.broadcast %cst_90 : f32 to vector<8x128xf32>
    %120 = arith.mulf %119, %117 : vector<8x128xf32>
    %121 = arith.mulf %117, %120 : vector<8x128xf32>
    %122 = arith.mulf %118, %121 : vector<8x128xf32>
    %123 = math.exp %122 : vector<8x128xf32>
    %124 = arith.mulf %123, %117 : vector<8x128xf32>
    %125 = arith.subf %106, %124 : vector<8x128xf32>
    %c1_91 = arith.constant 1 : index
    %c0_92 = arith.constant 0 : index
    %c0_93 = arith.constant 0 : index
    %126 = vector.load %arg1[%c1_91, %c0_92, %c0_93] : memref<2x8x128xf32, #tpu.memory_space<vmem>>, vector<1x8x128xf32>
    %127 = vector.shape_cast %126 : vector<1x8x128xf32> to vector<8x128xf32>
    %c1_94 = arith.constant 1 : index
    %c0_95 = arith.constant 0 : index
    %c0_96 = arith.constant 0 : index
    %128 = vector.load %arg3[%c1_94, %c0_95, %c0_96] : memref<2x8x128xf32, #tpu.memory_space<vmem>>, vector<1x8x128xf32>
    %129 = vector.shape_cast %128 : vector<1x8x128xf32> to vector<8x128xf32>
    %130 = arith.subf %127, %129 : vector<8x128xf32>
    %c1_97 = arith.constant 1 : index
    %c0_98 = arith.constant 0 : index
    %c0_99 = arith.constant 0 : index
    %131 = vector.load %arg6[%c1_97, %c0_98, %c0_99] : memref<2x8x128xf32, #tpu.memory_space<vmem>>, vector<1x8x128xf32>
    %132 = vector.shape_cast %131 : vector<1x8x128xf32> to vector<8x128xf32>
    %c1_100 = arith.constant 1 : index
    %c0_101 = arith.constant 0 : index
    %c0_102 = arith.constant 0 : index
    %133 = vector.load %arg7[%c1_100, %c0_101, %c0_102] : memref<2x8x128xf32, #tpu.memory_space<vmem>>, vector<1x8x128xf32>
    %134 = vector.shape_cast %133 : vector<1x8x128xf32> to vector<8x128xf32>
    %135 = arith.addf %132, %134 : vector<8x128xf32>
    %136 = math.rsqrt %135 : vector<8x128xf32>
    %137 = arith.mulf %130, %130 : vector<8x128xf32>
    %cst_103 = arith.constant -5.000000e-01 : f32
    %138 = vector.broadcast %cst_103 : f32 to vector<8x128xf32>
    %139 = arith.mulf %138, %136 : vector<8x128xf32>
    %140 = arith.mulf %136, %139 : vector<8x128xf32>
    %141 = arith.mulf %137, %140 : vector<8x128xf32>
    %142 = math.exp %141 : vector<8x128xf32>
    %143 = arith.mulf %142, %136 : vector<8x128xf32>
    %144 = arith.subf %125, %143 : vector<8x128xf32>
    %cst_104 = arith.constant dense<0.000000e+00> : vector<128xf32>
    %145 = vector.multi_reduction <add>, %144, %cst_104 [0] : vector<8x128xf32> to vector<128xf32>
    %146 = vector.shape_cast %145 : vector<128xf32> to vector<1x128xf32>
    %147 = vector.shape_cast %146 : vector<1x128xf32> to vector<1x1x128xf32>
    %c0_105 = arith.constant 0 : index
    %c0_106 = arith.constant 0 : index
    %c0_107 = arith.constant 0 : index
    %148 = vector.load %arg5[%c0_105, %c0_106, %c0_107] : memref<1x1x128xf32, #tpu.memory_space<vmem>>, vector<1x1x128xf32>
    tpu.vector_store %arg5[%c0_105, %c0_106, %c0_107], %147 {strides = array<i32>} : memref<1x1x128xf32, #tpu.memory_space<vmem>>, vector<1x1x128xf32>,
    return
  }
  func.func @transform_0(%arg0: i32) -> (i32, i32, i32) {
    %c0_i32 = arith.constant 0 : i32
    %c0_i32_0 = arith.constant 0 : i32
    %c0_i32_1 = arith.constant 0 : i32
    return %c0_i32, %arg0, %c0_i32_0 : i32, i32, i32
  }
  func.func @transform_1(%arg0: i32) -> (i32, i32, i32) {
    %c0_i32 = arith.constant 0 : i32
    %c0_i32_0 = arith.constant 0 : i32
    %c0_i32_1 = arith.constant 0 : i32
    return %c0_i32, %arg0, %c0_i32_0 : i32, i32, i32
  }
  func.func @transform_2(%arg0: i32) -> (i32, i32, i32) {
    %c0_i32 = arith.constant 0 : i32
    %c0_i32_0 = arith.constant 0 : i32
    %c0_i32_1 = arith.constant 0 : i32
    return %c0_i32, %arg0, %c0_i32_0 : i32, i32, i32
  }
  func.func @transform_3(%arg0: i32) -> (i32, i32, i32) {
    %c0_i32 = arith.constant 0 : i32
    %c0_i32_0 = arith.constant 0 : i32
    %c0_i32_1 = arith.constant 0 : i32
    return %c0_i32, %arg0, %c0_i32_0 : i32, i32, i32
  }
  func.func @transform_4(%arg0: i32) -> (i32, i32, i32) {
    %c0_i32 = arith.constant 0 : i32
    %c0_i32_0 = arith.constant 0 : i32
    %c0_i32_1 = arith.constant 0 : i32
    return %arg0, %c0_i32, %c0_i32_0 : i32, i32, i32
  }
}

</mosaic_0001>

<bundles_post_ra>
// kernel: gaussian_distance.1
= control target key start
LH: loop header
LB: loop body
LE: loop exit
PB: predicated region body
PF: predicated region fallthrough
CT: control target
= control target key end

     0   :  { %s240_s1 = inlined_call_operand.vmem [shape: f32[2,8,128], index: 1, kind: input, shape index: {}]   ;;  %s241_s3 = inlined_call_operand.vmem [shape: f32[2,8,128], index: 3, kind: input, shape index: {}]   ;;  %s242_s0 = inlined_call_operand.vmem [shape: f32[2,8,128], index: 0, kind: input, shape index: {}]   ;;  %s243_s2 = inlined_call_operand.vmem [shape: f32[2,8,128], index: 2, kind: input, shape index: {}]   ;;  %s244_s4 = inlined_call_operand.vmem [shape: f32[1,1,128], index: 4, kind: output, shape index: {}]  }
   0x1   :  { %v17_v0 = vld [vmem:[%s240_s1] sm:$0xff]  ;;  %v18_v1 = vld [vmem:[%s240_s1 + $0x8] sm:$0xff] }
   0x2   :  { %v25_v2 = vld [vmem:[%s241_s3] sm:$0xff]  ;;  %v19_v3 = vmul.f32 1.442695, %v17_v0  ;;  %v21_v4 = vmul.f32 1.442695, %v18_v1  ;;  %v26_v5 = vld [vmem:[%s241_s3 + $0x8] sm:$0xff] }
   0x3   :  { %v27_v6 = vmul.f32 1.442695, %v25_v2  ;;  %v29_v7 = vmul.f32 1.442695, %v26_v5  ;;  %v41_v17 = vld [vmem:[%s242_s0] sm:$0xff]  ;;  %v134_v18 = vld [vmem:[%s242_s0 + $0x8] sm:$0xff] }
   0x4   :  { %136 = vpow2.f32 %v19_v3  ;;  %v57_v20 = vld [vmem:[%s243_s2] sm:$0xff]  ;;  %v135_v21 = vld [vmem:[%s243_s2 + $0x8] sm:$0xff]  ;;  %v44_v22 = vsub.f32 %v41_v17, %v134_v18 }
   0x5   :  { %138 = vpow2.f32 %v21_v4  ;;  %v60_v23 = vsub.f32 %v57_v20, %v135_v21  ;;  %v73_v26 = vsub.f32 %v41_v17, %v57_v20  ;;  %v84_v27 = vsub.f32 %v41_v17, %v135_v21 }
   0x6   :  { %140 = vpow2.f32 %v27_v6  ;;  %v49_v29 = vmul.f32 %v44_v22, %v44_v22  ;;  %v101_v32 = vsub.f32 %v134_v18, %v57_v20  ;;  %v112_v37 = vsub.f32 %v134_v18, %v135_v21 }
   0x7   :  { %142 = vpow2.f32 %v29_v7  ;;  %v65_v35 = vmul.f32 %v60_v23, %v60_v23  ;;  %v76_v39 = vmul.f32 %v73_v26, %v73_v26  ;;  %v87_v41 = vmul.f32 %v84_v27, %v84_v27 }
   0x8   :  { %v104_v52 = vmul.f32 %v101_v32, %v101_v32  ;;  %v115_v54 = vmul.f32 %v112_v37, %v112_v37 }
   0xe   :  { %v137_v8 = vpop.eup %136 }
   0xf   :  { %v213_v9 = vpop.eup %138  ;;  %v34_v25 = vmul.f32 8.0, %v137_v8 }
  0x10   :  { %v141_v10 = vpop.eup %140  ;;  %v47_v11 = vadd.f32 %v213_v9, %v137_v8  ;;  %v95_v62 = vmul.f32 8.0, %v213_v9 }
  0x11   :  { %v216_v12 = vpop.eup %142  ;;  %v74_v13 = vadd.f32 %v141_v10, %v137_v8  ;;  %v102_v16 = vadd.f32 %v141_v10, %v213_v9  ;;  %v38_v28 = vmul.f32 8.0, %v141_v10 }
  0x12   :  { %144 = vrsqrt.f32 %v47_v11  ;;  %v63_v14 = vadd.f32 %v216_v12, %v141_v10  ;;  %v85_v15 = vadd.f32 %v216_v12, %v137_v8  ;;  %v113_v19 = vadd.f32 %v216_v12, %v213_v9 }
  0x13   :  { %v98_v2 = vmul.f32 8.0, %v216_v12 }
  0x14   :  { %146 = vrsqrt.f32 %v63_v14 }
  0x15   :  { %148 = vrsqrt.f32 %v74_v13 }
  0x16   :  { %150 = vrsqrt.f32 %v85_v15 }
  0x17   :  { %152 = vrsqrt.f32 %v102_v16 }
  0x18   :  { %154 = vrsqrt.f32 %v113_v19 }
  0x19   :  { %156 = vrsqrt.f32 %v34_v25 }
  0x1a   :  { %158 = vrsqrt.f32 %v38_v28 }
  0x1c   :  { %v145_v24 = vpop.eup %144 }
  0x1d   :  { %v50_v30 = vmul.f32 -0.5, %v145_v24 }
  0x1e   :  { %v147_v31 = vpop.eup %146 }
  0x1f   :  { %v149_v33 = vpop.eup %148  ;;  %v51_v34 = vmul.f32 %v145_v24, %v50_v30  ;;  %v66_v36 = vmul.f32 -0.5, %v147_v31 }
  0x20   :  { %v151_v38 = vpop.eup %150  ;;  %v77_v40 = vmul.f32 -0.5, %v149_v33 }
  0x21   :  { %v52_v42 = vmul.f32 %v51_v34, %v49_v29  ;;  %v67_v43 = vmul.f32 %v147_v31, %v66_v36  ;;  %v88_v44 = vmul.f32 -0.5, %v151_v38  ;;  %v153_v46 = vpop.eup %152 }
  0x22   :  { %v78_v45 = vmul.f32 %v149_v33, %v77_v40  ;;  %v155_v50 = vpop.eup %154  ;;  %v105_v53 = vmul.f32 -0.5, %v153_v46 }
  0x23   :  { %v53_v47 = vmul.f32 1.442695, %v52_v42  ;;  %v68_v48 = vmul.f32 %v67_v43, %v65_v35  ;;  %v89_v49 = vmul.f32 %v151_v38, %v88_v44  ;;  %v116_v57 = vmul.f32 -0.5, %v155_v50  ;;  %v157_v1 = vpop.eup %156 }
  0x24   :  { %v79_v51 = vmul.f32 %v78_v45, %v76_v39  ;;  %v106_v59 = vmul.f32 %v153_v46, %v105_v53  ;;  %v159_v4 = vpop.eup %158 }
  0x25   :  { %160 = vpow2.f32 %v53_v47  ;;  %v69_v55 = vmul.f32 1.442695, %v68_v48  ;;  %v90_v56 = vmul.f32 %v89_v49, %v87_v41  ;;  %v117_v61 = vmul.f32 %v155_v50, %v116_v57 }
  0x26   :  { %v80_v58 = vmul.f32 1.442695, %v79_v51  ;;  %v107_v63 = vmul.f32 %v106_v59, %v104_v52  ;;  %v40_v6 = vadd.f32 %v159_v4, %v157_v1 }
  0x27   :  { %162 = vpow2.f32 %v69_v55  ;;  %v91_v60 = vmul.f32 1.442695, %v90_v56  ;;  %v118_v0 = vmul.f32 %v117_v61, %v115_v54 }
  0x28   :  { %164 = vpow2.f32 %v80_v58  ;;  %v108_v3 = vmul.f32 1.442695, %v107_v63 }
  0x29   :  { %166 = vpow2.f32 %v91_v60  ;;  %v119_v5 = vmul.f32 1.442695, %v118_v0 }
  0x2a   :  { %168 = vrsqrt.f32 %v95_v62 }
  0x2b   :  { %170 = vpow2.f32 %v108_v3 }
  0x2c   :  { %172 = vrsqrt.f32 %v98_v2 }
  0x2d   :  { %174 = vpow2.f32 %v119_v5 }
  0x2f   :  { %v161_v7 = vpop.eup %160 }
  0x30   :  { %v55_v8 = vmul.f32 %v161_v7, %v145_v24 }
  0x31   :  { %v163_v10 = vpop.eup %162 }
  0x32   :  { %v165_v11 = vpop.eup %164  ;;  %v56_v13 = vadd.f32 %v55_v8, %v40_v6  ;;  %v71_v9 = vmul.f32 %v163_v10, %v147_v31 }
  0x33   :  { %v167_v14 = vpop.eup %166  ;;  %v82_v15 = vmul.f32 %v165_v11, %v149_v33 }
  0x34   :  { %v72_v16 = vadd.f32 %v71_v9, %v56_v13  ;;  %v93_v17 = vmul.f32 %v167_v14, %v151_v38  ;;  %v169_v18 = vpop.eup %168 }
  0x35   :  { %v171_v19 = vpop.eup %170 }
  0x36   :  { %v83_v12 = vsub.f32 %v72_v16, %v82_v15  ;;  %v173_v20 = vpop.eup %172  ;;  %v110_v25 = vmul.f32 %v171_v19, %v153_v46 }
  0x37   :  { %v175_v22 = vpop.eup %174 }
  0x38   :  { %v94_v21 = vsub.f32 %v83_v12, %v93_v17  ;;  %v121_v27 = vmul.f32 %v175_v22, %v155_v50 }
  0x3a   :  { %v97_v23 = vadd.f32 %v169_v18, %v94_v21 }
  0x3c   :  { %v100_v26 = vadd.f32 %v173_v20, %v97_v23 }
  0x3e   :  { %v111_v28 = vsub.f32 %v100_v26, %v110_v25 }
  0x40   :  { %v122_v24 = vsub.f32 %v111_v28, %v121_v27 }
  0x42   :  { %v123_v29 = vrot.slane %v122_v24, 4 }
  0x44   :  { %v124_v30 = vadd.f32 %v123_v29, %v122_v24 }
  0x46   :  { %v125_v32 = vrot.slane %v124_v30, 2 }
  0x48   :  { %v126_v31 = vadd.f32 %v125_v32, %v124_v30 }
  0x4a   :  { %v127_v34 = vrot.slane %v126_v31, 1 }
  0x4c   :  { %v128_v33 = vadd.f32 %v127_v34, %v126_v31 }
  0x4e   :  { %129 = vst [vmem:[%s244_s4] sm:$0x1] %v128_v33 }

</bundles_post_ra>
